<compile_context>
chip_gen: v5e
topology: v5e:2x2
jax: 0.10.0
libtpu: 0.0.40
codegen_flags: <defaults>
</compile_context>

<pallas_src>
import functools

import jax
import jax.numpy as jnp
from jax.experimental import pallas as pl
from jax.experimental.pallas import tpu as pltpu


def _round_up(x, m):
    return ((x + m - 1) // m) * m


def simple_nn_kernel(x_ref, w1_ref, b1_ref, w2_ref, b2_ref, o_ref):
    # In-kernel bf16 cast of the x tile (avoids a wrapper-side HBM pass).
    x = x_ref[...].astype(jnp.bfloat16)
    # fc1: (TB, D)bf16 @ (D, H)bf16 -> f32 accumulate, + bias (f32), ReLU.
    h = jnp.dot(x, w1_ref[...], preferred_element_type=jnp.float32)
    h = jnp.maximum(h + b1_ref[...], 0.0)
    # fc2: (TB, H)bf16 @ (H, Cp)bf16 -> f32 accumulate on a full-width slab.
    out = jnp.dot(h.astype(jnp.bfloat16), w2_ref[...],
                  preferred_element_type=jnp.float32)
    # Store only the C real classes (narrow masked store; HBM writes stay
    # 4*C bytes/row instead of 512 bytes/row).
    c = o_ref.shape[-1]
    o_ref[...] = (out[:, :c] + b2_ref[...]).astype(o_ref.dtype)


def prepare_params(w1, b1, w2, b2, *, lane=128):
    """One-time conversion of PyTorch-layout nn.Linear params to kernel layout.

    Inputs (PyTorch layout):
      w1: (H, D)  fc1.weight     b1: (H,)  fc1.bias
      w2: (C, H)  fc2.weight     b2: (C,)  fc2.bias
    Returns:
      w1_bf: (D, H)  bf16        b1p: (1, H)  f32
      w2_bf: (H, Cp) bf16 (lane-padded, zeros beyond C)
      b2p:   (1, C)  f32
    """
    H, D = w1.shape
    C = w2.shape[0]
    Cp = _round_up(C, lane)
    w1_bf = w1.T.astype(jnp.bfloat16)                                   # (D, H)
    w2_bf = (jnp.zeros((H, Cp), jnp.bfloat16)
             .at[:, :C].set(w2.T.astype(jnp.bfloat16)))                 # (H, Cp)
    b1p = b1.reshape(1, H).astype(jnp.float32)
    b2p = b2.reshape(1, C).astype(jnp.float32)
    return w1_bf, b1p, w2_bf, b2p


@functools.partial(jax.jit, static_argnames=("block_b", "use_core_parallel"))
def simple_nn_forward(x, params, *, block_b=2048, use_core_parallel=False):
    """Fused fc1 -> ReLU -> fc2.

    x:      (B, D) float32
    params: output of prepare_params (weights already bf16 / pre-transposed).
    returns (B, C) float32 logits
    """
    w1_bf, b1, w2_bf, b2 = params
    B, D = x.shape
    H = w1_bf.shape[1]
    Cp = w2_bf.shape[1]
    C = b2.shape[1]

    # Minimal batch padding only (<= 7 rows) to satisfy the sublane multiple.
    B_pad = _round_up(B, 8)
    if B_pad != B:
        x = jnp.pad(x, ((0, B_pad - B), (0, 0)))

    # Large batch tile to amortize per-grid-step overhead; never larger than
    # the (padded) batch, so no tile-sized padding is ever introduced.
    TB = min(block_b, B_pad)
    grid = (pl.cdiv(B_pad, TB),)

    # On v7x, CORE_PARALLEL on the batch axis shards the grid across both
    # TensorCores (only meaningful when grid has >= 2 steps).
    if use_core_parallel and grid[0] >= 2:
        batch_sem = pltpu.CORE_PARALLEL
    else:
        batch_sem = "parallel"

    out = pl.pallas_call(
        simple_nn_kernel,
        out_shape=jax.ShapeDtypeStruct((B_pad, C), jnp.float32),
        grid=grid,
        in_specs=[
            pl.BlockSpec((TB, D), lambda i: (i, 0)),   # x tile (f32), pipelined
            pl.BlockSpec((D, H), lambda i: (0, 0)),    # w1 (bf16), resident
            pl.BlockSpec((1, H), lambda i: (0, 0)),    # b1 (f32), resident
            pl.BlockSpec((H, Cp), lambda i: (0, 0)),   # w2 padded (bf16), resident
            pl.BlockSpec((1, C), lambda i: (0, 0)),    # b2 (f32), resident
            # (For reuse at large D/H on v7x, the four resident specs could add
            #  pipeline_mode=pl.Buffered(1) to drop their second VMEM buffer.)
        ],
        out_specs=pl.BlockSpec((TB, C), lambda i: (i, 0)),
        compiler_params=pltpu.CompilerParams(
            dimension_semantics=(batch_sem,),
            # Explicit limit so large tiles compile on v5e's 16 MiB default
            # scoped VMEM; actual usage here is only a few MiB.
            vmem_limit_bytes=32 * 1024 * 1024,
        ),
    )(x, w1_bf, b1, w2_bf, b2)

    return out[:B]


def init_params(key, input_size, hidden=128, num_classes=2):
    """Deterministic synthetic init in PyTorch nn.Linear layout (out, in)."""
    k1, k2, k3, k4 = jax.random.split(key, 4)
    bound1 = 1.0 / jnp.sqrt(input_size)
    bound2 = 1.0 / jnp.sqrt(hidden)
    w1 = jax.random.uniform(k1, (hidden, input_size), jnp.float32, -bound1, bound1)
    b1 = jax.random.uniform(k2, (hidden,), jnp.float32, -bound1, bound1)
    w2 = jax.random.uniform(k3, (num_classes, hidden), jnp.float32, -bound2, bound2)
    b2 = jax.random.uniform(k4, (num_classes,), jnp.float32, -bound2, bound2)
    return w1, b1, w2, b2


if __name__ == "__main__":
    key = jax.random.PRNGKey(0)
    kx, kp = jax.random.split(key)

    batch = 8
    input_size = 16  # churn-feature vector length (small synthetic choice)

    x = jax.random.normal(kx, (batch, input_size), dtype=jnp.float32)
    w1, b1, w2, b2 = init_params(kp, input_size)

    # One-time weight preparation (hoisted out of the per-call path).
    params = prepare_params(w1, b1, w2, b2)

    out = simple_nn_forward(x, params)
    out = jax.block_until_ready(out)
    assert out.shape == (batch, 2)

    # Reference with matching bf16-input / f32-accumulate numerics.
    h_ref = jnp.maximum(
        jnp.dot(x.astype(jnp.bfloat16), w1.T.astype(jnp.bfloat16),
                preferred_element_type=jnp.float32) + b1[None, :], 0.0)
    ref_bf16 = jnp.dot(h_ref.astype(jnp.bfloat16), w2.T.astype(jnp.bfloat16),
                       preferred_element_type=jnp.float32) + b2[None, :]
    assert jnp.allclose(out, ref_bf16, atol=1e-3, rtol=1e-3)

    # Loose check against the pure-f32 PyTorch-equivalent reference
    # (bf16 quantization error only).
    ref_f32 = jnp.maximum(x @ w1.T + b1[None, :], 0.0) @ w2.T + b2[None, :]
    assert jnp.allclose(out, ref_f32, atol=5e-2, rtol=5e-2)

    print("KERNEL_OK")
</pallas_src>

<mosaic_0001>
module attributes {stable_mosaic.version = 11 : i64} {
  func.func @simple_nn_kernel(%arg0: i32, %arg1: memref<8x16xf32, #tpu.memory_space<vmem>>, %arg2: memref<16x128xbf16, #tpu.memory_space<vmem>>, %arg3: memref<1x128xf32, #tpu.memory_space<vmem>>, %arg4: memref<128x128xbf16, #tpu.memory_space<vmem>>, %arg5: memref<1x2xf32, #tpu.memory_space<vmem>>, %arg6: memref<8x2xf32, #tpu.memory_space<vmem>>) attributes {dimension_semantics = [#tpu.dimension_semantics<parallel>], iteration_bounds = array<i64: 1>, scalar_prefetch = 0 : i64, scratch_operands = 0 : i64, tpu.core_type = #tpu.core_type<tc>, window_params = [{transform_indices = @transform_0, window_bounds = array<i64: 8, 16>}, {pipeline_mode = #tpu.pipeline_mode<synchronous>, transform_indices = @transform_1, window_bounds = array<i64: 16, 128>}, {pipeline_mode = #tpu.pipeline_mode<synchronous>, transform_indices = @transform_2, window_bounds = array<i64: 1, 128>}, {pipeline_mode = #tpu.pipeline_mode<synchronous>, transform_indices = @transform_3, window_bounds = array<i64: 128, 128>}, {pipeline_mode = #tpu.pipeline_mode<synchronous>, transform_indices = @transform_4, window_bounds = array<i64: 1, 2>}, {transform_indices = @transform_5, window_bounds = array<i64: 8, 2>}]} {
    %c0 = arith.constant 0 : index
    %c0_0 = arith.constant 0 : index
    %0 = vector.load %arg1[%c0, %c0_0] : memref<8x16xf32, #tpu.memory_space<vmem>>, vector<8x16xf32>
    %1 = arith.truncf %0 : vector<8x16xf32> to vector<8x16xbf16>
    %c0_1 = arith.constant 0 : index
    %c0_2 = arith.constant 0 : index
    %2 = vector.load %arg2[%c0_1, %c0_2] : memref<16x128xbf16, #tpu.memory_space<vmem>>, vector<16x128xbf16>
    %cst = arith.constant dense<0.000000e+00> : vector<8x128xf32>
    %3 = tpu.matmul %1, %2, %cst {dimension_numbers = #tpu.dot_dimension_numbers<[1], [0], [0], [1], [0, 0, 1, 1], [], []>} : vector<8x16xbf16>, vector<16x128xbf16>, vector<8x128xf32> -> vector<8x128xf32>
    %c0_3 = arith.constant 0 : index
    %c0_4 = arith.constant 0 : index
    %4 = vector.load %arg3[%c0_3, %c0_4] : memref<1x128xf32, #tpu.memory_space<vmem>>, vector<1x128xf32>
    %5 = vector.broadcast %4 : vector<1x128xf32> to vector<8x128xf32>
    %6 = arith.addf %3, %5 : vector<8x128xf32>
    %cst_5 = arith.constant 0.000000e+00 : f32
    %7 = vector.broadcast %cst_5 : f32 to vector<8x128xf32>
    %8 = arith.maximumf %6, %7 : vector<8x128xf32>
    %9 = arith.truncf %8 : vector<8x128xf32> to vector<8x128xbf16>
    %c0_6 = arith.constant 0 : index
    %c0_7 = arith.constant 0 : index
    %10 = vector.load %arg4[%c0_6, %c0_7] : memref<128x128xbf16, #tpu.memory_space<vmem>>, vector<128x128xbf16>
    %cst_8 = arith.constant dense<0.000000e+00> : vector<8x128xf32>
    %11 = tpu.matmul %9, %10, %cst_8 {dimension_numbers = #tpu.dot_dimension_numbers<[1], [0], [0], [1], [0, 0, 1, 1], [], []>} : vector<8x128xbf16>, vector<128x128xbf16>, vector<8x128xf32> -> vector<8x128xf32>
    %12 = vector.extract_strided_slice %11 {offsets = [0, 0], sizes = [8, 2], strides = [1, 1]} : vector<8x128xf32> to vector<8x2xf32>
    %c0_9 = arith.constant 0 : index
    %c0_10 = arith.constant 0 : index
    %13 = vector.load %arg5[%c0_9, %c0_10] : memref<1x2xf32, #tpu.memory_space<vmem>>, vector<1x2xf32>
    %14 = vector.broadcast %13 : vector<1x2xf32> to vector<8x2xf32>
    %15 = arith.addf %12, %14 : vector<8x2xf32>
    %c0_11 = arith.constant 0 : index
    %c0_12 = arith.constant 0 : index
    %16 = vector.load %arg6[%c0_11, %c0_12] : memref<8x2xf32, #tpu.memory_space<vmem>>, vector<8x2xf32>
    tpu.vector_store %arg6[%c0_11, %c0_12], %15 {strides = array<i32>} : memref<8x2xf32, #tpu.memory_space<vmem>>, vector<8x2xf32>,
    return
  }
  func.func @transform_0(%arg0: i32) -> (i32, i32) {
    %c0_i32 = arith.constant 0 : i32
    %c0_i32_0 = arith.constant 0 : i32
    return %arg0, %c0_i32 : i32, i32
  }
  func.func @transform_1(%arg0: i32) -> (i32, i32) {
    %c0_i32 = arith.constant 0 : i32
    %c0_i32_0 = arith.constant 0 : i32
    %c0_i32_1 = arith.constant 0 : i32
    return %c0_i32, %c0_i32_0 : i32, i32
  }
  func.func @transform_2(%arg0: i32) -> (i32, i32) {
    %c0_i32 = arith.constant 0 : i32
    %c0_i32_0 = arith.constant 0 : i32
    %c0_i32_1 = arith.constant 0 : i32
    return %c0_i32, %c0_i32_0 : i32, i32
  }
  func.func @transform_3(%arg0: i32) -> (i32, i32) {
    %c0_i32 = arith.constant 0 : i32
    %c0_i32_0 = arith.constant 0 : i32
    %c0_i32_1 = arith.constant 0 : i32
    return %c0_i32, %c0_i32_0 : i32, i32
  }
  func.func @transform_4(%arg0: i32) -> (i32, i32) {
    %c0_i32 = arith.constant 0 : i32
    %c0_i32_0 = arith.constant 0 : i32
    %c0_i32_1 = arith.constant 0 : i32
    return %c0_i32, %c0_i32_0 : i32, i32
  }
  func.func @transform_5(%arg0: i32) -> (i32, i32) {
    %c0_i32 = arith.constant 0 : i32
    %c0_i32_0 = arith.constant 0 : i32
    return %arg0, %c0_i32 : i32, i32
  }
}

</mosaic_0001>

<bundles_post_ra>
// kernel: simple_nn_forward.1
= control target key start
LH: loop header
LB: loop body
LE: loop exit
PB: predicated region body
PF: predicated region fallthrough
CT: control target
= control target key end

     0   :  { %10 = vsyncpa [#allocation3], 0  ;;  %s371_s0 = inlined_call_operand.hbm [shape: f32[8,16], index: 0, kind: input, shape index: {}]   ;;  %s372_s1 = inlined_call_operand.hbm [shape: bf16[16,128], index: 1, kind: input, shape index: {}]   ;;  %s373_s2 = inlined_call_operand.vmem [shape: f32[1,128], index: 2, kind: input, shape index: {}]   ;;  %s374_s3 = inlined_call_operand.hbm [shape: bf16[128,128], index: 3, kind: input, shape index: {}]   ;;  %s375_s4 = inlined_call_operand.vmem [shape: f32[1,2], index: 4, kind: input, shape index: {}]   ;;  %s376_s5 = inlined_call_operand.vmem [shape: f32[8,2], index: 5, kind: output, shape index: {}]  }
   0x1   :  { %11 = vsyncpa [#allocation5], 0  ;;  %s27_s20 = sshll.u32 %s372_s1, 4  ;;  %s318_s21 = smov [#allocation4]   ;;  %s28_s20 = int_to_ptr.hbm [resolvable:$true] %s27_s20 }
   0x2   :  { %s29_s22 = sshll.u32 %s318_s21, 4  ;;  %s17_s25 = sshll.u32 %s371_s0, 4  ;;  %s30_s22 = int_to_ptr.vmem [resolvable:$true] %s29_s22  ;;  %s18_s25 = int_to_ptr.hbm [resolvable:$true] %s17_s25 }
   0x3   :  { %s319_s26 = smov 64   ;;  %s320_s27 = smov 4  }
   0x4   :  { %35 = dma.hbm_to_vmem [thread:$0]  %s28_s20, 128, %s30_s22, [#allocation5], %s319_s26, %s319_s26, %s320_s27  }
   0x5   :  { %s321_s28 = smov [#allocation2]   ;;  %s42_s7 = sshll.u32 %s374_s3, 4  ;;  %s43_s7 = int_to_ptr.hbm [resolvable:$true] %s42_s7 }
   0x6   :  { %s19_s29 = sshll.u32 %s321_s28, 4  ;;  %s322_s1 = smov [#allocation6]   ;;  %s20_s29 = int_to_ptr.vmem [resolvable:$true] %s19_s29 }
   0x7   :  { %22 = dma.hbm_to_vmem [thread:$0]  %s18_s25, 128, %s20_s29, [#allocation3]  }
   0x8   :  { %s44_s8 = sshll.u32 %s322_s1, 4  ;;  %s45_s8 = int_to_ptr.vmem [resolvable:$true] %s44_s8 }
   0x9   :  { %50 = dma.hbm_to_vmem [thread:$0]  %s43_s7, 1024, %s45_s8, [#allocation5], %s319_s26, %s319_s26, %s320_s27  }
   0xa   :  { %314 = dma.done.wait [#allocation3], 128  }
   0xb   :  { %315 = vsyncadd [#allocation3], 4294967168 }
   0xc   :  { %316 = dma.done.wait [#allocation5], 1152  }
   0xd   :  { %317 = vsyncadd [#allocation5], 4294966144  ;;  %v226_v0 = vld [vmem:[#allocation4] sm:$0xff]  ;;  %v66_v1 = vld [vmem:[#allocation2] sm:$0xff]  ;;  %vm80_vm0 = vcmask 130048   ;;  %vm181_vm1 = vcmask 15360  }
   0xe   :  { %v234_v2 = vld [vmem:[#allocation6 + $0x38] sm:$0xff]  ;;  %v67_v3 = vpack.c.bf16 %v66_v1, %v66_v1  ;;  %91 = vmatpush.bf16.msra.mxu0 %v226_v0  ;;  %v233_v4 = vld [vmem:[#allocation6 + $0x30] sm:$0xff]  ;;  %v232_v5 = vld [vmem:[#allocation6 + $0x28] sm:$0xff] }
   0xf   :  { %163 = vmatpush.bf16.msra.mxu1 %v234_v2  ;;  %v231_v6 = vld [vmem:[#allocation6 + $0x20] sm:$0xff]  ;;  %v230_v7 = vld [vmem:[#allocation6 + $0x18] sm:$0xff]  ;;  %v229_v8 = vld [vmem:[#allocation6 + $0x10] sm:$0xff] }
  0x10   :  { %v228_v9 = vld [vmem:[#allocation6 + $0x8] sm:$0xff]  ;;  %v227_v10 = vld [vmem:[#allocation6] sm:$0xff]  ;;  %v240_v11 = vld [vmem:[%s373_s2] ss:$0 sm:$0xff] }
  0x11   :  { %193 = vmatmul.msk.bf16.vlgmr.msra.gmra.mxu0 %vm80_vm0, %v67_v3  ;;  %v241_v17 = vld [vmem:[%s375_s4] ss:$0 sm:$0xff] }
  0x13   :  { %164 = vmatpush.bf16.msra.mxu1 %v233_v4 }
  0x17   :  { %165 = vmatpush.bf16.msra.mxu1 %v232_v5 }
  0x1b   :  { %166 = vmatpush.bf16.msra.mxu1 %v231_v6 }
  0x1f   :  { %167 = vmatpush.bf16.msra.mxu1 %v230_v7 }
  0x23   :  { %168 = vmatpush.bf16.msra.mxu1 %v229_v8 }
  0x27   :  { %169 = vmatpush.bf16.msra.mxu1 %v228_v9 }
  0x2b   :  { %170 = vmatpush.bf16.msra.mxu1 %v227_v10 }
  0x8e   :  { %v93_v12 = vpop.f32.mrf.mxu0 }
  0x8f   :  { %v94_v13 = vadd.f32 %v240_v11, %v93_v12 }
  0x91   :  { %v97_v14 = vmax.f32 %v94_v13, 0.0 }
  0x93   :  { %v98_v15 = vpack.c.bf16 %v97_v14, %v97_v14 }
  0x95   :  { %171 = vmatmul.bf16.vlgmr.msra.gmra.mxu1 %v98_v15 }
  0x96   :  { %v95_v16 = vpop.f32.mrf.mxu0 }
 0x112   :  { %v172_v18 = vpop.f32.mrf.mxu1 }
 0x113   :  { %v180_v19 = vadd.f32 %v241_v17, %v172_v18 }
 0x115   :  { %182 = vst.msk [vmem:[%s376_s5] sm:$0xff] %vm181_vm1, %v180_v19 }
 0x11a   :  { %v174_v20 = vpop.f32.mrf.mxu1 }
 0x11b   :  { %187 = vsyncpa [#allocation3], 1 }
 0x11c   :  { %188 = vsyncpa [#allocation5], 1 }

</bundles_post_ra>
